<compile_context>
chip_gen: v5e
topology: v5e:2x2
jax: 0.10.0
libtpu: 0.0.40
codegen_flags: <defaults>
</compile_context>

<pallas_src>
import functools

import jax
import jax.numpy as jnp
from jax import lax
from jax.experimental import pallas as pl
from jax.experimental.pallas import tpu as pltpu


def _round_up(x, m):
    return ((x + m - 1) // m) * m


def _largest_divisor_tile(n_units, max_units):
    """Largest d <= max_units such that n_units % d == 0 (n_units >= 1)."""
    best = 1
    for d in range(1, min(n_units, max_units) + 1):
        if n_units % d == 0:
            best = d
    return best


def _vmem_limit(nbytes):
    # generous headroom, but never above v7x's 64 MiB physical VMEM.
    return int(min(max(nbytes + (4 << 20), 32 << 20), 64 << 20))


# --------------------------------------------------------------------------
# Stage 1: hidden = text @ W (flattened over batch*nodes -> fat-M GEMM)
#          plus a literal 1.0 written into padding column `ones_col`, so
#          stage 2's MXU produces rowsum(adj) as a by-product.
# --------------------------------------------------------------------------
def _hidden_kernel(text_ref, w_ref, hid_ref, *, ones_col):
    h = jnp.dot(text_ref[...].astype(jnp.bfloat16), w_ref[...],
                preferred_element_type=jnp.float32)
    col = lax.broadcasted_iota(jnp.int32, h.shape, 1)
    h = jnp.where(col == ones_col, 1.0, h)
    hid_ref[...] = h.astype(hid_ref.dtype)


# --------------------------------------------------------------------------
# Stage 2: out = (adj @ hidden) / (rowsum(adj) + 1) + bias, tiled over N.
# hidden column `den_col` is all-ones, so acc[:, den_col] == rowsum(adj).
# --------------------------------------------------------------------------
def _aggregate_kernel(adj_ref, hid_ref, b_ref, out_ref, acc_ref, *,
                      tk, den_col, hid_resident):
    k = pl.program_id(2)

    @pl.when(k == 0)
    def _init():
        acc_ref[...] = jnp.zeros_like(acc_ref)

    # cast in-kernel (cheap VPU) so adj HBM traffic stays at its native dtype
    adj = adj_ref[...].astype(jnp.bfloat16)                    # (tm, tk)
    if hid_resident:
        # whole per-batch hidden lives in VMEM; slice the k-tile rows
        hid = hid_ref[pl.ds(pl.multiple_of(k * tk, 128), tk), :]
    else:
        hid = hid_ref[...]
    acc_ref[...] += jnp.dot(adj, hid, preferred_element_type=jnp.float32)

    @pl.when(k == pl.num_programs(2) - 1)
    def _finalize():
        acc = acc_ref[...]
        col = lax.broadcasted_iota(jnp.int32, acc.shape, 1)
        denom = jnp.sum(jnp.where(col == den_col, acc, 0.0),
                        axis=1, keepdims=True) + 1.0           # rowsum(adj)+1
        inv = pl.reciprocal(denom, approx=False)               # exact divide
        out_ref[...] = (acc * inv + b_ref[...]).astype(out_ref.dtype)


def graph_convolution(text, adj, weight, bias=None):
    """Pallas GCN layer matching GraphConvolution.forward(text, adj)."""
    B, N, F_in = text.shape
    assert weight.shape[0] == F_in
    F_out = weight.shape[1]
    assert adj.shape == (B, N, N)
    out_dtype = text.dtype

    # ---- padding: lane-dense features, 128-aligned N (no 256 over-pad) ----
    F_in_p = _round_up(F_in, 128)
    F_out_p = _round_up(F_out + 1, 128)        # >=1 pad col for the ones/denom
    N_p = _round_up(N, 128)

    # pad only when needed; adj keeps its native dtype (cast happens in-kernel)
    adj_p = adj if N_p == N else jnp.pad(
        adj, ((0, 0), (0, N_p - N), (0, N_p - N)))
    text_p = text if (N_p == N and F_in_p == F_in) else jnp.pad(
        text, ((0, 0), (0, N_p - N), (0, F_in_p - F_in)))
    w_p = jnp.zeros((F_in_p, F_out_p), jnp.bfloat16
                    ).at[:F_in, :F_out].set(weight.astype(jnp.bfloat16))
    if bias is None:
        b_p = jnp.zeros((1, F_out_p), jnp.float32)
    else:
        b_p = jnp.zeros((1, F_out_p), jnp.float32
                        ).at[0, :F_out].set(bias.astype(jnp.float32))

    adj_isz = jnp.dtype(adj_p.dtype).itemsize
    txt_isz = jnp.dtype(text_p.dtype).itemsize
    out_isz = jnp.dtype(out_dtype).itemsize

    # ---- stage 1: hidden = text @ W as one (B*N_p, F_in_p) GEMM ----
    M = B * N_p
    m_units = M // 128
    # TODO(synk): for very large F_in/F_out (weight block alone > ~24 MiB on
    # v7x) add K/F_out grid axes to stage 1 instead of keeping W untiled.
    w_bytes = F_in_p * F_out_p * 2 * 2                         # bf16, 2 bufs
    per_row = F_in_p * txt_isz * 2 + F_out_p * 2 * 2           # text + hidden
    max_rows = max(128, ((24 << 20) - w_bytes) // per_row)
    max_units = max(1, min(16, max_rows // 128))               # cap at 2048
    tm1 = _largest_divisor_tile(m_units, max_units) * 128
    s1_bytes = tm1 * per_row + w_bytes

    text_flat = text_p.reshape(M, F_in_p)
    hidden_flat = pl.pallas_call(
        functools.partial(_hidden_kernel, ones_col=F_out),
        out_shape=jax.ShapeDtypeStruct((M, F_out_p), jnp.bfloat16),
        grid_spec=pltpu.PrefetchScalarGridSpec(
            num_scalar_prefetch=0,
            grid=(M // tm1,),
            in_specs=[
                pl.BlockSpec((tm1, F_in_p), lambda m: (m, 0)),       # text rows
                pl.BlockSpec((F_in_p, F_out_p), lambda m: (0, 0)),   # weight
            ],
            out_specs=pl.BlockSpec((tm1, F_out_p), lambda m: (m, 0)),
        ),
        compiler_params=pltpu.CompilerParams(
            dimension_semantics=("parallel",),
            vmem_limit_bytes=_vmem_limit(s1_bytes),
        ),
    )(text_flat, w_p)
    hidden = hidden_flat.reshape(B, N_p, F_out_p)

    # ---- stage 2: tiled aggregation over adj ----
    n_units = N_p // 128
    t_units = _largest_divisor_tile(n_units, 8)                # tile <= 1024
    hid_resident = (N_p * F_out_p * 2 * 2) <= (8 << 20)        # 2 bufs, bf16

    def s2_bytes(t_u, resident):
        t = t_u * 128
        hid_rows = N_p if resident else t
        return (t * t * adj_isz * 2                            # adj tile
                + hid_rows * F_out_p * 2 * 2                   # hidden (bf16)
                + t * F_out_p * out_isz * 2                    # out tile
                + t * F_out_p * 4                              # acc scratch
                + F_out_p * 4 * 2)                             # bias

    while t_units > 1 and s2_bytes(t_units, hid_resident) > (26 << 20):
        t_units = _largest_divisor_tile(n_units, t_units - 1)
    if s2_bytes(t_units, hid_resident) > (26 << 20):
        hid_resident = False
    tm = tk = t_units * 128

    if hid_resident:
        hid_spec = pl.BlockSpec((pl.Squeezed(), N_p, F_out_p),
                                lambda b, i, k: (b, 0, 0))
    else:
        hid_spec = pl.BlockSpec((pl.Squeezed(), tk, F_out_p),
                                lambda b, i, k: (b, k, 0))

    out_p = pl.pallas_call(
        functools.partial(_aggregate_kernel, tk=tk, den_col=F_out,
                          hid_resident=hid_resident),
        out_shape=jax.ShapeDtypeStruct((B, N_p, F_out_p), out_dtype),
        grid_spec=pltpu.PrefetchScalarGridSpec(
            num_scalar_prefetch=0,
            grid=(B, N_p // tm, N_p // tk),
            in_specs=[
                # adj row/col tile (batch dim squeezed -> kernel sees 2-D)
                pl.BlockSpec((pl.Squeezed(), tm, tk),
                             lambda b, i, k: (b, i, k)),
                hid_spec,                                      # per-batch hidden
                pl.BlockSpec((1, F_out_p), lambda b, i, k: (0, 0)),  # bias
            ],
            out_specs=pl.BlockSpec((pl.Squeezed(), tm, F_out_p),
                                   lambda b, i, k: (b, i, 0)),
            scratch_shapes=[
                pltpu.VMEM((tm, F_out_p), jnp.float32),        # f32 accumulator
            ],
        ),
        compiler_params=pltpu.CompilerParams(
            dimension_semantics=("parallel", "parallel", "arbitrary"),
            vmem_limit_bytes=_vmem_limit(s2_bytes(t_units, hid_resident)),
        ),
    )(adj_p, hidden, b_p)

    return out_p[:, :N, :F_out]


def graph_convolution_ref(text, adj, weight, bias):
    hidden = jnp.matmul(text, weight)
    denom = jnp.sum(adj, axis=2, keepdims=True) + 1.0
    out = jnp.matmul(adj, hidden) / denom
    return out + bias


if __name__ == "__main__":
    key = jax.random.PRNGKey(0)
    k_text, k_adj, k_w, k_b = jax.random.split(key, 4)

    B, N = 2, 16          # batch, num nodes (sequence length)
    F_in, F_out = 32, 32  # in_features, out_features

    text = jax.random.normal(k_text, (B, N, F_in), dtype=jnp.float32)
    # non-negative adjacency, like a masked/weighted graph
    adj = jax.random.uniform(k_adj, (B, N, N), dtype=jnp.float32)

    # Deterministic synthetic parameters (not a checkpoint load).
    weight = jax.random.normal(k_w, (F_in, F_out), dtype=jnp.float32) * 0.1
    bias = jax.random.normal(k_b, (F_out,), dtype=jnp.float32) * 0.1

    out = graph_convolution(text, adj, weight, bias)
    out = jax.block_until_ready(out)

    ref = graph_convolution_ref(text, adj, weight, bias)
    assert out.shape == (B, N, F_out)
    # bf16 MXU inputs (f32 accumulation, exact divide) -> loosened tolerance
    assert jnp.allclose(out, ref, atol=2e-2, rtol=2e-2), float(
        jnp.max(jnp.abs(out - ref)))

    print("KERNEL_OK")
</pallas_src>

<mosaic_0001>
module attributes {stable_mosaic.version = 11 : i64} {
  func.func @_hidden_kernel(%arg0: i32, %arg1: memref<256x128xf32, #tpu.memory_space<vmem>>, %arg2: memref<128x128xbf16, #tpu.memory_space<vmem>>, %arg3: memref<256x128xbf16, #tpu.memory_space<vmem>>) attributes {dimension_semantics = [#tpu.dimension_semantics<parallel>], iteration_bounds = array<i64: 1>, scalar_prefetch = 0 : i64, scratch_operands = 0 : i64, tpu.core_type = #tpu.core_type<tc>, window_params = [{transform_indices = @transform_0, window_bounds = array<i64: 256, 128>}, {pipeline_mode = #tpu.pipeline_mode<synchronous>, transform_indices = @transform_1, window_bounds = array<i64: 128, 128>}, {transform_indices = @transform_2, window_bounds = array<i64: 256, 128>}]} {
    %c0 = arith.constant 0 : index
    %c0_0 = arith.constant 0 : index
    %0 = vector.load %arg1[%c0, %c0_0] : memref<256x128xf32, #tpu.memory_space<vmem>>, vector<256x128xf32>
    %1 = arith.truncf %0 : vector<256x128xf32> to vector<256x128xbf16>
    %c0_1 = arith.constant 0 : index
    %c0_2 = arith.constant 0 : index
    %2 = vector.load %arg2[%c0_1, %c0_2] : memref<128x128xbf16, #tpu.memory_space<vmem>>, vector<128x128xbf16>
    %cst = arith.constant dense<0.000000e+00> : vector<256x128xf32>
    %3 = tpu.matmul %1, %2, %cst {dimension_numbers = #tpu.dot_dimension_numbers<[1], [0], [0], [1], [0, 0, 1, 1], [], []>} : vector<256x128xbf16>, vector<128x128xbf16>, vector<256x128xf32> -> vector<256x128xf32>
    %4 = tpu.iota {dimensions = array<i32: 1>} : vector<256x128xi32>
    %c32_i32 = arith.constant 32 : i32
    %5 = vector.broadcast %c32_i32 : i32 to vector<256x128xi32>
    %6 = arith.cmpi eq, %4, %5 : vector<256x128xi32>
    %cst_3 = arith.constant 1.000000e+00 : f32
    %7 = vector.broadcast %cst_3 : f32 to vector<256x128xf32>
    %8 = arith.select %6, %7, %3 : vector<256x128xi1>, vector<256x128xf32>
    %9 = arith.truncf %8 : vector<256x128xf32> to vector<256x128xbf16>
    %c0_4 = arith.constant 0 : index
    %c0_5 = arith.constant 0 : index
    %10 = vector.load %arg3[%c0_4, %c0_5] : memref<256x128xbf16, #tpu.memory_space<vmem>>, vector<256x128xbf16>
    tpu.vector_store %arg3[%c0_4, %c0_5], %9 {strides = array<i32>} : memref<256x128xbf16, #tpu.memory_space<vmem>>, vector<256x128xbf16>,
    return
  }
  func.func @transform_0(%arg0: i32) -> (i32, i32) {
    %c0_i32 = arith.constant 0 : i32
    %c0_i32_0 = arith.constant 0 : i32
    return %arg0, %c0_i32 : i32, i32
  }
  func.func @transform_1(%arg0: i32) -> (i32, i32) {
    %c0_i32 = arith.constant 0 : i32
    %c0_i32_0 = arith.constant 0 : i32
    %c0_i32_1 = arith.constant 0 : i32
    return %c0_i32, %c0_i32_0 : i32, i32
  }
  func.func @transform_2(%arg0: i32) -> (i32, i32) {
    %c0_i32 = arith.constant 0 : i32
    %c0_i32_0 = arith.constant 0 : i32
    return %arg0, %c0_i32 : i32, i32
  }
}

</mosaic_0001>

<bundles_post_ra>
// kernel: tpu_custom_call.1
= control target key start
LH: loop header
LB: loop body
LE: loop exit
PB: predicated region body
PF: predicated region fallthrough
CT: control target
= control target key end

     0   :  { %7 = vsyncpa [#allocation3], 0  ;;  %s712_s0 = inlined_call_operand.hbm [shape: f32[256,128], index: 0, kind: input, shape index: {}]   ;;  %s713_s1 = inlined_call_operand.hbm [shape: bf16[128,128], index: 1, kind: input, shape index: {}]   ;;  %s714_s2 = inlined_call_operand.hbm [shape: bf16[256,128], index: 2, kind: output, shape index: {}]  }
   0x1   :  { %8 = vsyncpa [#allocation6], 0 }
   0x2   :  { %9 = vsyncpa [#allocation4], 0  ;;  %s14_s11 = sshll.u32 %s712_s0, 4  ;;  %s608_s12 = smov [#allocation2]   ;;  %s15_s11 = int_to_ptr.hbm [resolvable:$true] %s14_s11 }
   0x3   :  { %s16_s13 = sshll.u32 %s608_s12, 4  ;;  %s27_s16 = sshll.u32 %s713_s1, 4  ;;  %s17_s13 = int_to_ptr.vmem [resolvable:$true] %s16_s13  ;;  %s28_s16 = int_to_ptr.hbm [resolvable:$true] %s27_s16 }
   0x4   :  { %s609_s17 = smov 128   ;;  %s610_s18 = smov 8  }
   0x5   :  { %22 = dma.hbm_to_vmem [thread:$0]  %s15_s11, 4096, %s17_s13, [#allocation3], %s609_s17, %s609_s17, %s610_s18  }
   0x6   :  { %s611_s19 = smov [#allocation5]   ;;  %s612_s21 = smov 64  }
   0x7   :  { %s29_s20 = sshll.u32 %s611_s19, 4  ;;  %s613_s22 = smov 4   ;;  %s30_s20 = int_to_ptr.vmem [resolvable:$true] %s29_s20 }
   0x8   :  { %35 = dma.hbm_to_vmem [thread:$0]  %s28_s16, 1024, %s30_s20, [#allocation6], %s612_s21, %s612_s21, %s613_s22  }
   0x9   :  { %602 = dma.done.wait [#allocation3], 4096  }
   0xa   :  { %603 = vsyncadd [#allocation3], 4294963200 }
   0xb   :  { %604 = dma.done.wait [#allocation6], 1024  }
   0xc   :  { %605 = vsyncadd [#allocation6], 4294966272  ;;  %v403_v0 = vld [vmem:[#allocation5 + $0x38] sm:$0xff]  ;;  %v402_v1 = vld [vmem:[#allocation5 + $0x30] sm:$0xff]  ;;  %v245_v56 = vlaneseq  ;;  %s614_s0 = smov [#allocation7]   ;;  %s350_s25 = sshll.u32 %s714_s2, 4  ;;  %s351_s25 = int_to_ptr.hbm [resolvable:$true] %s350_s25 }
   0xd   :  { %156 = vmatpush.bf16.msra.mxu0 %v403_v0  ;;  %499 = vmatpush.bf16.msra.mxu1 %v403_v0  ;;  %v401_v2 = vld [vmem:[#allocation5 + $0x28] sm:$0xff]  ;;  %v400_v3 = vld [vmem:[#allocation5 + $0x20] sm:$0xff]  ;;  %v399_v4 = vld [vmem:[#allocation5 + $0x18] sm:$0xff]  ;;  %s348_s1 = sshll.u32 %s614_s0, 4  ;;  %s349_s1 = int_to_ptr.vmem [resolvable:$true] %s348_s1 }
   0xe   :  { %500 = vmatpush.bf16.msra.mxu2 %v403_v0  ;;  %501 = vmatpush.bf16.msra.mxu3 %v403_v0  ;;  %v398_v5 = vld [vmem:[#allocation5 + $0x10] sm:$0xff]  ;;  %v397_v6 = vld [vmem:[#allocation5 + $0x8] sm:$0xff]  ;;  %v396_v7 = vld [vmem:[#allocation5] sm:$0xff]  ;;  %v639_v59 = vand.u32 127, %v245_v56 }
   0xf   :  { %v44_v8 = vld [vmem:[#allocation2] sm:$0xff]  ;;  %v45_v9 = vld [vmem:[#allocation2 + $0x8] sm:$0xff]  ;;  %v46_v20 = vld [vmem:[#allocation2 + $0x10] sm:$0xff] }
  0x10   :  { %v52_v10 = vld [vmem:[#allocation2 + $0x40] sm:$0xff]  ;;  %v53_v11 = vld [vmem:[#allocation2 + $0x48] sm:$0xff]  ;;  %v76_v16 = vpack.c.bf16 %v45_v9, %v44_v8  ;;  %v47_v21 = vld [vmem:[#allocation2 + $0x18] sm:$0xff]  ;;  %vm247_vm0 = vcmp.eq.s32.totalorder %v639_v59, 32 }
  0x11   :  { %157 = vmatpush.bf16.msra.mxu0 %v402_v1  ;;  %502 = vmatpush.bf16.msra.mxu1 %v402_v1  ;;  %v60_v12 = vld [vmem:[#allocation2 + $0x80] sm:$0xff]  ;;  %v61_v13 = vld [vmem:[#allocation2 + $0x88] sm:$0xff]  ;;  %v80_v17 = vpack.c.bf16 %v53_v11, %v52_v10  ;;  %v54_v22 = vld [vmem:[#allocation2 + $0x50] sm:$0xff]  ;;  %v77_v28 = vpack.c.bf16 %v47_v21, %v46_v20 }
  0x12   :  { %503 = vmatpush.bf16.msra.mxu2 %v402_v1  ;;  %504 = vmatpush.bf16.msra.mxu3 %v402_v1  ;;  %v68_v14 = vld [vmem:[#allocation2 + $0xc0] sm:$0xff]  ;;  %v69_v15 = vld [vmem:[#allocation2 + $0xc8] sm:$0xff]  ;;  %v84_v18 = vpack.c.bf16 %v61_v13, %v60_v12  ;;  %v55_v23 = vld [vmem:[#allocation2 + $0x58] sm:$0xff] }
  0x13   :  { %v88_v19 = vpack.c.bf16 %v69_v15, %v68_v14  ;;  %v62_v24 = vld [vmem:[#allocation2 + $0x90] sm:$0xff]  ;;  %v63_v25 = vld [vmem:[#allocation2 + $0x98] sm:$0xff]  ;;  %v81_v29 = vpack.c.bf16 %v55_v23, %v54_v22  ;;  %v48_v32 = vld [vmem:[#allocation2 + $0x20] sm:$0xff] }
  0x14   :  { %v70_v26 = vld [vmem:[#allocation2 + $0xd0] sm:$0xff]  ;;  %v71_v27 = vld [vmem:[#allocation2 + $0xd8] sm:$0xff]  ;;  %v85_v30 = vpack.c.bf16 %v63_v25, %v62_v24  ;;  %v49_v33 = vld [vmem:[#allocation2 + $0x28] sm:$0xff] }
  0x15   :  { %158 = vmatpush.bf16.msra.mxu0 %v401_v2  ;;  %505 = vmatpush.bf16.msra.mxu1 %v401_v2  ;;  %v89_v31 = vpack.c.bf16 %v71_v27, %v70_v26  ;;  %v56_v34 = vld [vmem:[#allocation2 + $0x60] sm:$0xff]  ;;  %v57_v35 = vld [vmem:[#allocation2 + $0x68] sm:$0xff]  ;;  %v78_v40 = vpack.c.bf16 %v49_v33, %v48_v32  ;;  %v50_v44 = vld [vmem:[#allocation2 + $0x30] sm:$0xff] }
  0x16   :  { %506 = vmatpush.bf16.msra.mxu2 %v401_v2  ;;  %507 = vmatpush.bf16.msra.mxu3 %v401_v2  ;;  %v64_v36 = vld [vmem:[#allocation2 + $0xa0] sm:$0xff]  ;;  %v65_v37 = vld [vmem:[#allocation2 + $0xa8] sm:$0xff]  ;;  %v82_v41 = vpack.c.bf16 %v57_v35, %v56_v34  ;;  %v51_v45 = vld [vmem:[#allocation2 + $0x38] sm:$0xff] }
  0x17   :  { %v72_v38 = vld [vmem:[#allocation2 + $0xe0] sm:$0xff]  ;;  %v73_v39 = vld [vmem:[#allocation2 + $0xe8] sm:$0xff]  ;;  %v86_v42 = vpack.c.bf16 %v65_v37, %v64_v36  ;;  %v58_v46 = vld [vmem:[#allocation2 + $0x70] sm:$0xff]  ;;  %v79_v52 = vpack.c.bf16 %v51_v45, %v50_v44 }
  0x18   :  { %v90_v43 = vpack.c.bf16 %v73_v39, %v72_v38  ;;  %v59_v47 = vld [vmem:[#allocation2 + $0x78] sm:$0xff]  ;;  %v66_v48 = vld [vmem:[#allocation2 + $0xb0] sm:$0xff] }
  0x19   :  { %159 = vmatpush.bf16.msra.mxu0 %v400_v3  ;;  %508 = vmatpush.bf16.msra.mxu1 %v400_v3  ;;  %v67_v49 = vld [vmem:[#allocation2 + $0xb8] sm:$0xff]  ;;  %v74_v50 = vld [vmem:[#allocation2 + $0xf0] sm:$0xff]  ;;  %v83_v53 = vpack.c.bf16 %v59_v47, %v58_v46 }
  0x1a   :  { %509 = vmatpush.bf16.msra.mxu2 %v400_v3  ;;  %510 = vmatpush.bf16.msra.mxu3 %v400_v3  ;;  %v75_v51 = vld [vmem:[#allocation2 + $0xf8] sm:$0xff]  ;;  %v87_v54 = vpack.c.bf16 %v67_v49, %v66_v48 }
  0x1b   :  { %v91_v55 = vpack.c.bf16 %v75_v51, %v74_v50 }
  0x1d   :  { %160 = vmatpush.bf16.msra.mxu0 %v399_v4  ;;  %511 = vmatpush.bf16.msra.mxu1 %v399_v4 }
  0x1e   :  { %512 = vmatpush.bf16.msra.mxu2 %v399_v4  ;;  %513 = vmatpush.bf16.msra.mxu3 %v399_v4 }
  0x21   :  { %161 = vmatpush.bf16.msra.mxu0 %v398_v5  ;;  %514 = vmatpush.bf16.msra.mxu1 %v398_v5 }
  0x22   :  { %515 = vmatpush.bf16.msra.mxu2 %v398_v5  ;;  %516 = vmatpush.bf16.msra.mxu3 %v398_v5 }
  0x25   :  { %162 = vmatpush.bf16.msra.mxu0 %v397_v6  ;;  %517 = vmatpush.bf16.msra.mxu1 %v397_v6 }
  0x26   :  { %518 = vmatpush.bf16.msra.mxu2 %v397_v6  ;;  %519 = vmatpush.bf16.msra.mxu3 %v397_v6 }
  0x29   :  { %163 = vmatpush.bf16.msra.mxu0 %v396_v7  ;;  %520 = vmatpush.bf16.msra.mxu1 %v396_v7 }
  0x2a   :  { %521 = vmatpush.bf16.msra.mxu2 %v396_v7  ;;  %522 = vmatpush.bf16.msra.mxu3 %v396_v7 }
  0x2c   :  { %164 = vmatmul.bf16.vlgmr.msra.gmra.mxu0 %v76_v16  ;;  %184 = vmatmul.bf16.vlgmr.msra.gmra.mxu1 %v80_v17 }
  0x2d   :  { %204 = vmatmul.bf16.vlgmr.msra.gmra.mxu2 %v84_v18  ;;  %224 = vmatmul.bf16.vlgmr.msra.gmra.mxu3 %v88_v19 }
  0x3c   :  { %169 = vmatmul.bf16.gmra.mxu0 %v77_v28  ;;  %189 = vmatmul.bf16.gmra.mxu1 %v81_v29 }
  0x3d   :  { %209 = vmatmul.bf16.gmra.mxu2 %v85_v30  ;;  %229 = vmatmul.bf16.gmra.mxu3 %v89_v31 }
  0x4c   :  { %174 = vmatmul.bf16.gmra.mxu0 %v78_v40  ;;  %194 = vmatmul.bf16.gmra.mxu1 %v82_v41 }
  0x4d   :  { %214 = vmatmul.bf16.gmra.mxu2 %v86_v42  ;;  %234 = vmatmul.bf16.gmra.mxu3 %v90_v43 }
  0x5c   :  { %179 = vmatmul.bf16.gmra.mxu0 %v79_v52  ;;  %199 = vmatmul.bf16.gmra.mxu1 %v83_v53 }
  0x5d   :  { %219 = vmatmul.bf16.gmra.mxu2 %v87_v54  ;;  %239 = vmatmul.bf16.gmra.mxu3 %v91_v55 }
  0xa9   :  { %v165_v57 = vpop.f32.mrf.mxu0  ;;  %v185_v58 = vpop.f32.mrf.mxu1 }
  0xaa   :  { %v248_v0 = vsel %vm247_vm0, 1.0, %v165_v57  ;;  %v256_v1 = vsel %vm247_vm0, 1.0, %v185_v58 }
  0xb0   :  { %v205_v60 = vpop.f32.mrf.mxu2  ;;  %v225_v61 = vpop.f32.mrf.mxu3 }
  0xb1   :  { %v167_v62 = vpop.f32.mrf.mxu0  ;;  %v187_v63 = vpop.f32.mrf.mxu1  ;;  %v264_v8 = vsel %vm247_vm0, 1.0, %v205_v60  ;;  %v272_v9 = vsel %vm247_vm0, 1.0, %v225_v61 }
  0xb2   :  { %v249_v2 = vsel %vm247_vm0, 1.0, %v167_v62  ;;  %v257_v3 = vsel %vm247_vm0, 1.0, %v187_v63 }
  0xb3   :  { %v407_v4 = vpack.c.bf16 %v249_v2, %v248_v0  ;;  %v427_v5 = vpack.c.bf16 %v257_v3, %v256_v1 }
  0xb5   :  { %408 = vst [vmem:[#allocation7] sm:$0xff] %v407_v4  }
  0xb6   :  { %487 = vst [vmem:[#allocation7 + $0x20] sm:$0xff] %v427_v5  }
  0xb8   :  { %v207_v6 = vpop.f32.mrf.mxu2  ;;  %v227_v7 = vpop.f32.mrf.mxu3 }
  0xb9   :  { %v265_v10 = vsel %vm247_vm0, 1.0, %v207_v6  ;;  %v273_v11 = vsel %vm247_vm0, 1.0, %v227_v7  ;;  %v170_v12 = vpop.f32.mrf.mxu0  ;;  %v190_v13 = vpop.f32.mrf.mxu1 }
  0xba   :  { %v447_v14 = vpack.c.bf16 %v265_v10, %v264_v8  ;;  %v467_v15 = vpack.c.bf16 %v273_v11, %v272_v9  ;;  %v250_v20 = vsel %vm247_vm0, 1.0, %v170_v12  ;;  %v258_v21 = vsel %vm247_vm0, 1.0, %v190_v13 }
  0xbc   :  { %491 = vst [vmem:[#allocation7 + $0x40] sm:$0xff] %v447_v14  }
  0xbd   :  { %495 = vst [vmem:[#allocation7 + $0x60] sm:$0xff] %v467_v15  }
  0xc0   :  { %v210_v16 = vpop.f32.mrf.mxu2  ;;  %v230_v17 = vpop.f32.mrf.mxu3 }
  0xc1   :  { %v172_v18 = vpop.f32.mrf.mxu0  ;;  %v192_v19 = vpop.f32.mrf.mxu1  ;;  %v266_v28 = vsel %vm247_vm0, 1.0, %v210_v16  ;;  %v274_v29 = vsel %vm247_vm0, 1.0, %v230_v17 }
  0xc2   :  { %v251_v22 = vsel %vm247_vm0, 1.0, %v172_v18  ;;  %v259_v23 = vsel %vm247_vm0, 1.0, %v192_v19 }
  0xc3   :  { %v412_v24 = vpack.c.bf16 %v251_v22, %v250_v20  ;;  %v432_v25 = vpack.c.bf16 %v259_v23, %v258_v21 }
  0xc5   :  { %484 = vst [vmem:[#allocation7 + $0x8] sm:$0xff] %v412_v24  }
  0xc6   :  { %488 = vst [vmem:[#allocation7 + $0x28] sm:$0xff] %v432_v25  }
  0xc8   :  { %v212_v26 = vpop.f32.mrf.mxu2  ;;  %v232_v27 = vpop.f32.mrf.mxu3 }
  0xc9   :  { %v267_v30 = vsel %vm247_vm0, 1.0, %v212_v26  ;;  %v275_v31 = vsel %vm247_vm0, 1.0, %v232_v27  ;;  %v175_v32 = vpop.f32.mrf.mxu0  ;;  %v195_v33 = vpop.f32.mrf.mxu1 }
  0xca   :  { %v452_v34 = vpack.c.bf16 %v267_v30, %v266_v28  ;;  %v472_v35 = vpack.c.bf16 %v275_v31, %v274_v29  ;;  %v252_v40 = vsel %vm247_vm0, 1.0, %v175_v32  ;;  %v260_v41 = vsel %vm247_vm0, 1.0, %v195_v33 }
  0xcc   :  { %492 = vst [vmem:[#allocation7 + $0x48] sm:$0xff] %v452_v34  }
  0xcd   :  { %496 = vst [vmem:[#allocation7 + $0x68] sm:$0xff] %v472_v35  }
  0xd0   :  { %v215_v36 = vpop.f32.mrf.mxu2  ;;  %v235_v37 = vpop.f32.mrf.mxu3 }
  0xd1   :  { %v177_v38 = vpop.f32.mrf.mxu0  ;;  %v197_v39 = vpop.f32.mrf.mxu1  ;;  %v268_v48 = vsel %vm247_vm0, 1.0, %v215_v36  ;;  %v276_v49 = vsel %vm247_vm0, 1.0, %v235_v37 }
  0xd2   :  { %v253_v42 = vsel %vm247_vm0, 1.0, %v177_v38  ;;  %v261_v43 = vsel %vm247_vm0, 1.0, %v197_v39 }
  0xd3   :  { %v417_v44 = vpack.c.bf16 %v253_v42, %v252_v40  ;;  %v437_v45 = vpack.c.bf16 %v261_v43, %v260_v41 }
  0xd5   :  { %485 = vst [vmem:[#allocation7 + $0x10] sm:$0xff] %v417_v44  }
  0xd6   :  { %489 = vst [vmem:[#allocation7 + $0x30] sm:$0xff] %v437_v45  }
  0xd8   :  { %v217_v46 = vpop.f32.mrf.mxu2  ;;  %v237_v47 = vpop.f32.mrf.mxu3 }
  0xd9   :  { %v269_v50 = vsel %vm247_vm0, 1.0, %v217_v46  ;;  %v277_v51 = vsel %vm247_vm0, 1.0, %v237_v47  ;;  %v180_v52 = vpop.f32.mrf.mxu0  ;;  %v200_v53 = vpop.f32.mrf.mxu1 }
  0xda   :  { %v457_v54 = vpack.c.bf16 %v269_v50, %v268_v48  ;;  %v477_v55 = vpack.c.bf16 %v277_v51, %v276_v49  ;;  %v254_v61 = vsel %vm247_vm0, 1.0, %v180_v52  ;;  %v262_v62 = vsel %vm247_vm0, 1.0, %v200_v53 }
  0xdc   :  { %493 = vst [vmem:[#allocation7 + $0x50] sm:$0xff] %v457_v54  }
  0xdd   :  { %497 = vst [vmem:[#allocation7 + $0x70] sm:$0xff] %v477_v55  }
  0xe0   :  { %v220_v56 = vpop.f32.mrf.mxu2  ;;  %v240_v57 = vpop.f32.mrf.mxu3 }
  0xe1   :  { %v182_v58 = vpop.f32.mrf.mxu0  ;;  %v202_v60 = vpop.f32.mrf.mxu1  ;;  %v270_v5 = vsel %vm247_vm0, 1.0, %v220_v56  ;;  %v278_v6 = vsel %vm247_vm0, 1.0, %v240_v57 }
  0xe2   :  { %v255_v63 = vsel %vm247_vm0, 1.0, %v182_v58  ;;  %v263_v0 = vsel %vm247_vm0, 1.0, %v202_v60 }
  0xe3   :  { %v422_v1 = vpack.c.bf16 %v255_v63, %v254_v61  ;;  %v442_v2 = vpack.c.bf16 %v263_v0, %v262_v62 }
  0xe5   :  { %486 = vst [vmem:[#allocation7 + $0x18] sm:$0xff] %v422_v1  }
  0xe6   :  { %490 = vst [vmem:[#allocation7 + $0x38] sm:$0xff] %v442_v2  }
  0xe8   :  { %v222_v3 = vpop.f32.mrf.mxu2  ;;  %v242_v4 = vpop.f32.mrf.mxu3 }
  0xe9   :  { %v271_v7 = vsel %vm247_vm0, 1.0, %v222_v3  ;;  %v279_v8 = vsel %vm247_vm0, 1.0, %v242_v4 }
  0xea   :  { %v462_v9 = vpack.c.bf16 %v271_v7, %v270_v5  ;;  %v482_v10 = vpack.c.bf16 %v279_v8, %v278_v6 }
  0xec   :  { %494 = vst [vmem:[#allocation7 + $0x58] sm:$0xff] %v462_v9  }
  0xed   :  { %498 = vst [vmem:[#allocation7 + $0x78] sm:$0xff] %v482_v10  }
  0xee   :  { %356 = dma.vmem_to_hbm [thread:$0]  %s349_s1, 2048, %s351_s25, [#allocation4], %s612_s21, %s612_s21, %s613_s22  }
  0xef   :  { %606 = dma.done.wait [#allocation4], 2048  }
  0xf0   :  { %607 = vsyncadd [#allocation4], 4294965248 }
  0xf1   :  { %361 = vsyncpa [#allocation3], 1 }
  0xf2   :  { %362 = vsyncpa [#allocation6], 1 }
  0xf3   :  { %363 = vsyncpa [#allocation4], 1 }

</bundles_post_ra>
